<compile_context>
chip_gen: v7x
topology: tpu7x:2x2x1
jax: 0.10.0
libtpu: 0.0.40
codegen_flags: <defaults>
</compile_context>

<pallas_src>
import functools

import jax
import jax.numpy as jnp
from jax.experimental import pallas as pl
from jax.experimental.pallas import tpu as pltpu

N_HIDDEN = 3  # number of hidden GraphConv layers between input and output layer

_LANE = 128     # TPU vreg lane count — pad feature dims to this
_SUBLANE = 16   # pad node dim to a multiple of 16 (covers bf16 sublane packing)


def _round_up(v, m):
    return ((v + m - 1) // m) * m


def _full_block(shape):
    """Whole-array BlockSpec for a grid-less pallas_call."""
    ndim = len(shape)
    return pl.BlockSpec(shape, lambda: (0,) * ndim)


def _gcn_fused_kernel(*refs, n_layers):
    """Fused 5-layer GCN forward.

    refs layout: adj, x, W_0..W_{L-1}, b_0..b_{L-1}, out, h_scratch
    All W are (F_pad, F_pad), b are (1, F_pad) f32, h/out are (N_pad, F_pad).
    """
    adj_ref, x_ref = refs[0], refs[1]
    w_refs = refs[2:2 + n_layers]
    b_refs = refs[2 + n_layers:2 + 2 * n_layers]
    o_ref = refs[2 + 2 * n_layers]
    h_ref = refs[2 + 2 * n_layers + 1]   # VMEM scratch holding the activation

    adj = adj_ref[...]                   # loaded once, reused by every layer
    h_ref[...] = x_ref[...]              # activations live in VMEM across layers

    # Static unroll over layers (shapes are uniform after padding to F_pad).
    for li in range(n_layers):
        w = w_refs[li][...]
        b = b_refs[li][...]              # (1, F_pad) f32, loaded once per layer
        # Feature transform first (narrow side), then N×N aggregation — do NOT
        # reorder to Â@X then @W (would multiply MXU work on the N×N side).
        xw = jnp.dot(h_ref[...], w, preferred_element_type=jnp.float32)
        agg = jnp.dot(adj, xw.astype(adj.dtype),
                      preferred_element_type=jnp.float32)
        agg = agg + b                    # bias + relu epilogue kept in f32
        if li < n_layers - 1:
            h_ref[...] = jnp.maximum(agg, 0.0).astype(h_ref.dtype)
        else:
            o_ref[...] = agg.astype(o_ref.dtype)   # lane-dense (F_pad) store


def gcn_forward(adj_norm, x, params, *, compute_dtype=jnp.bfloat16):
    """Full 5-layer GCN forward in one fused Pallas call.

    adj_norm: [N, N] normalized adjacency, x: [N, F_in], params: [(W_i, b_i)].
    Returns [N, num_classes] float32.
    """
    n, f_in = x.shape
    n_layers = len(params)
    num_classes = params[-1][0].shape[1]

    # Padded sizes: node dim to sublane multiple, feature dims to 128 lanes.
    n_pad = _round_up(n, _SUBLANE)
    f_dims = [f_in] + [w.shape[0] for w, _ in params] + [w.shape[1] for w, _ in params]
    f_pad = _round_up(max(f_dims), _LANE)

    def pad2d(a, rows, cols):
        r, c = a.shape
        return jnp.pad(a, ((0, rows - r), (0, cols - c)))

    adj_p = pad2d(adj_norm, n_pad, n_pad).astype(compute_dtype)
    x_p = pad2d(x, n_pad, f_pad).astype(compute_dtype)
    ws = [pad2d(w, f_pad, f_pad).astype(compute_dtype) for w, _ in params]
    bs = [jnp.pad(b, (0, f_pad - b.shape[0])).reshape(1, f_pad).astype(jnp.float32)
          for _, b in params]

    inputs = [adj_p, x_p] + ws + bs
    kernel = functools.partial(_gcn_fused_kernel, n_layers=n_layers)

    out_p = pl.pallas_call(
        kernel,
        out_shape=jax.ShapeDtypeStruct((n_pad, f_pad), jnp.float32),
        in_specs=[_full_block(a.shape) for a in inputs],
        out_specs=_full_block((n_pad, f_pad)),
        scratch_shapes=[pltpu.VMEM((n_pad, f_pad), compute_dtype)],
    )(*inputs)

    # Strip node / feature padding outside the kernel.
    return out_p[:n, :num_classes]


def normalized_adjacency(adj):
    """Â = D^{-1/2} (A + I) D^{-1/2}  (DGL GraphConv norm='both' + self-loops)."""
    n = adj.shape[0]
    a = adj + jnp.eye(n, dtype=adj.dtype)
    deg = jnp.sum(a, axis=1)
    d_inv_sqrt = jnp.where(deg > 0, 1.0 / jnp.sqrt(deg), 0.0)
    return a * d_inv_sqrt[:, None] * d_inv_sqrt[None, :]


def init_gcn_params(key, n_in, n_hidden, num_classes):
    """Deterministic Glorot-style init for the 5 GraphConv layers."""
    dims = [(n_in, n_hidden)]
    dims += [(n_hidden, n_hidden)] * N_HIDDEN
    dims += [(n_hidden, num_classes)]
    params = []
    for (fi, fo) in dims:
        key, wk = jax.random.split(key)
        scale = jnp.sqrt(6.0 / (fi + fo))
        w = jax.random.uniform(wk, (fi, fo), jnp.float32, -scale, scale)
        b = jnp.zeros((fo,), jnp.float32)
        params.append((w, b))
    return params


def gcn_forward_ref(adj_norm, x, params, *, compute_dtype=jnp.float32):
    """Pure-JAX reference using the same cast scheme as the kernel."""
    adj = adj_norm.astype(compute_dtype)
    h = x.astype(compute_dtype)
    n_layers = len(params)
    out = None
    for li, (w, b) in enumerate(params):
        xw = jnp.dot(h, w.astype(compute_dtype), preferred_element_type=jnp.float32)
        agg = jnp.dot(adj, xw.astype(compute_dtype), preferred_element_type=jnp.float32)
        agg = agg + b[None, :]
        if li < n_layers - 1:
            h = jnp.maximum(agg, 0.0).astype(compute_dtype)
        else:
            out = agg
    return out


if __name__ == "__main__":
    key = jax.random.PRNGKey(0)

    # Small synthetic graph: 32 nodes, random features.
    n_nodes = 32
    n_in = 16
    n_hidden = 8
    num_classes = 4

    key, ak, xk, pk = jax.random.split(key, 4)
    # Random symmetric adjacency (no self loops; normalization adds them).
    upper = (jax.random.uniform(ak, (n_nodes, n_nodes)) < 0.15).astype(jnp.float32)
    upper = jnp.triu(upper, k=1)
    adj = upper + upper.T

    x = jax.random.normal(xk, (n_nodes, n_in), jnp.float32)
    params = init_gcn_params(pk, n_in, n_hidden, num_classes)
    adj_norm = normalized_adjacency(adj)

    # Full-precision path: tight check against the plain-JAX reference.
    out_f32 = jax.block_until_ready(
        gcn_forward(adj_norm, x, params, compute_dtype=jnp.float32))
    ref_f32 = gcn_forward_ref(adj_norm, x, params, compute_dtype=jnp.float32)
    assert out_f32.shape == (n_nodes, num_classes)
    assert jnp.allclose(out_f32, ref_f32, atol=1e-4, rtol=1e-4)

    # Default (bf16 inputs, f32 accumulation) path: check against a reference
    # that applies the identical cast scheme.
    out_bf16 = jax.block_until_ready(gcn_forward(adj_norm, x, params))
    ref_bf16 = gcn_forward_ref(adj_norm, x, params, compute_dtype=jnp.bfloat16)
    assert out_bf16.shape == (n_nodes, num_classes)
    assert jnp.allclose(out_bf16, ref_bf16, atol=2e-3, rtol=2e-3)

    print("KERNEL_OK")
</pallas_src>

<mosaic_0001>
module attributes {stable_mosaic.version = 11 : i64} {
  func.func @_gcn_fused_kernel(%arg0: memref<32x32xf32, #tpu.memory_space<vmem>>, %arg1: memref<32x128xf32, #tpu.memory_space<vmem>>, %arg2: memref<128x128xf32, #tpu.memory_space<vmem>>, %arg3: memref<128x128xf32, #tpu.memory_space<vmem>>, %arg4: memref<128x128xf32, #tpu.memory_space<vmem>>, %arg5: memref<128x128xf32, #tpu.memory_space<vmem>>, %arg6: memref<128x128xf32, #tpu.memory_space<vmem>>, %arg7: memref<1x128xf32, #tpu.memory_space<vmem>>, %arg8: memref<1x128xf32, #tpu.memory_space<vmem>>, %arg9: memref<1x128xf32, #tpu.memory_space<vmem>>, %arg10: memref<1x128xf32, #tpu.memory_space<vmem>>, %arg11: memref<1x128xf32, #tpu.memory_space<vmem>>, %arg12: memref<32x128xf32, #tpu.memory_space<vmem>>, %arg13: memref<32x128xf32, #tpu.memory_space<vmem>>) attributes {dimension_semantics = [], scalar_prefetch = 0 : i64, scratch_operands = 1 : i64, tpu.core_type = #tpu.core_type<tc>} {
    %c0 = arith.constant 0 : index
    %c0_0 = arith.constant 0 : index
    %0 = vector.load %arg0[%c0, %c0_0] : memref<32x32xf32, #tpu.memory_space<vmem>>, vector<32x32xf32>
    %c0_1 = arith.constant 0 : index
    %c0_2 = arith.constant 0 : index
    %1 = vector.load %arg1[%c0_1, %c0_2] : memref<32x128xf32, #tpu.memory_space<vmem>>, vector<32x128xf32>
    %c0_3 = arith.constant 0 : index
    %c0_4 = arith.constant 0 : index
    %2 = vector.load %arg13[%c0_3, %c0_4] : memref<32x128xf32, #tpu.memory_space<vmem>>, vector<32x128xf32>
    tpu.vector_store %arg13[%c0_3, %c0_4], %1 {strides = array<i32>} : memref<32x128xf32, #tpu.memory_space<vmem>>, vector<32x128xf32>,
    %c0_5 = arith.constant 0 : index
    %c0_6 = arith.constant 0 : index
    %3 = vector.load %arg2[%c0_5, %c0_6] : memref<128x128xf32, #tpu.memory_space<vmem>>, vector<128x128xf32>
    %c0_7 = arith.constant 0 : index
    %c0_8 = arith.constant 0 : index
    %4 = vector.load %arg7[%c0_7, %c0_8] : memref<1x128xf32, #tpu.memory_space<vmem>>, vector<1x128xf32>
    %c0_9 = arith.constant 0 : index
    %c0_10 = arith.constant 0 : index
    %5 = vector.load %arg13[%c0_9, %c0_10] : memref<32x128xf32, #tpu.memory_space<vmem>>, vector<32x128xf32>
    %cst = arith.constant dense<0.000000e+00> : vector<32x128xf32>
    %6 = tpu.matmul %5, %3, %cst {dimension_numbers = #tpu.dot_dimension_numbers<[1], [0], [0], [1], [0, 0, 1, 1], [], []>} : vector<32x128xf32>, vector<128x128xf32>, vector<32x128xf32> -> vector<32x128xf32>
    %cst_11 = arith.constant dense<0.000000e+00> : vector<32x128xf32>
    %7 = tpu.matmul %0, %6, %cst_11 {dimension_numbers = #tpu.dot_dimension_numbers<[1], [0], [0], [1], [0, 0, 1, 1], [], []>} : vector<32x32xf32>, vector<32x128xf32>, vector<32x128xf32> -> vector<32x128xf32>
    %8 = vector.broadcast %4 : vector<1x128xf32> to vector<32x128xf32>
    %9 = arith.addf %7, %8 : vector<32x128xf32>
    %cst_12 = arith.constant 0.000000e+00 : f32
    %10 = vector.broadcast %cst_12 : f32 to vector<32x128xf32>
    %11 = arith.maximumf %9, %10 : vector<32x128xf32>
    %c0_13 = arith.constant 0 : index
    %c0_14 = arith.constant 0 : index
    %12 = vector.load %arg13[%c0_13, %c0_14] : memref<32x128xf32, #tpu.memory_space<vmem>>, vector<32x128xf32>
    tpu.vector_store %arg13[%c0_13, %c0_14], %11 {strides = array<i32>} : memref<32x128xf32, #tpu.memory_space<vmem>>, vector<32x128xf32>,
    %c0_15 = arith.constant 0 : index
    %c0_16 = arith.constant 0 : index
    %13 = vector.load %arg3[%c0_15, %c0_16] : memref<128x128xf32, #tpu.memory_space<vmem>>, vector<128x128xf32>
    %c0_17 = arith.constant 0 : index
    %c0_18 = arith.constant 0 : index
    %14 = vector.load %arg8[%c0_17, %c0_18] : memref<1x128xf32, #tpu.memory_space<vmem>>, vector<1x128xf32>
    %c0_19 = arith.constant 0 : index
    %c0_20 = arith.constant 0 : index
    %15 = vector.load %arg13[%c0_19, %c0_20] : memref<32x128xf32, #tpu.memory_space<vmem>>, vector<32x128xf32>
    %cst_21 = arith.constant dense<0.000000e+00> : vector<32x128xf32>
    %16 = tpu.matmul %15, %13, %cst_21 {dimension_numbers = #tpu.dot_dimension_numbers<[1], [0], [0], [1], [0, 0, 1, 1], [], []>} : vector<32x128xf32>, vector<128x128xf32>, vector<32x128xf32> -> vector<32x128xf32>
    %cst_22 = arith.constant dense<0.000000e+00> : vector<32x128xf32>
    %17 = tpu.matmul %0, %16, %cst_22 {dimension_numbers = #tpu.dot_dimension_numbers<[1], [0], [0], [1], [0, 0, 1, 1], [], []>} : vector<32x32xf32>, vector<32x128xf32>, vector<32x128xf32> -> vector<32x128xf32>
    %18 = vector.broadcast %14 : vector<1x128xf32> to vector<32x128xf32>
    %19 = arith.addf %17, %18 : vector<32x128xf32>
    %cst_23 = arith.constant 0.000000e+00 : f32
    %20 = vector.broadcast %cst_23 : f32 to vector<32x128xf32>
    %21 = arith.maximumf %19, %20 : vector<32x128xf32>
    %c0_24 = arith.constant 0 : index
    %c0_25 = arith.constant 0 : index
    %22 = vector.load %arg13[%c0_24, %c0_25] : memref<32x128xf32, #tpu.memory_space<vmem>>, vector<32x128xf32>
    tpu.vector_store %arg13[%c0_24, %c0_25], %21 {strides = array<i32>} : memref<32x128xf32, #tpu.memory_space<vmem>>, vector<32x128xf32>,
    %c0_26 = arith.constant 0 : index
    %c0_27 = arith.constant 0 : index
    %23 = vector.load %arg4[%c0_26, %c0_27] : memref<128x128xf32, #tpu.memory_space<vmem>>, vector<128x128xf32>
    %c0_28 = arith.constant 0 : index
    %c0_29 = arith.constant 0 : index
    %24 = vector.load %arg9[%c0_28, %c0_29] : memref<1x128xf32, #tpu.memory_space<vmem>>, vector<1x128xf32>
    %c0_30 = arith.constant 0 : index
    %c0_31 = arith.constant 0 : index
    %25 = vector.load %arg13[%c0_30, %c0_31] : memref<32x128xf32, #tpu.memory_space<vmem>>, vector<32x128xf32>
    %cst_32 = arith.constant dense<0.000000e+00> : vector<32x128xf32>
    %26 = tpu.matmul %25, %23, %cst_32 {dimension_numbers = #tpu.dot_dimension_numbers<[1], [0], [0], [1], [0, 0, 1, 1], [], []>} : vector<32x128xf32>, vector<128x128xf32>, vector<32x128xf32> -> vector<32x128xf32>
    %cst_33 = arith.constant dense<0.000000e+00> : vector<32x128xf32>
    %27 = tpu.matmul %0, %26, %cst_33 {dimension_numbers = #tpu.dot_dimension_numbers<[1], [0], [0], [1], [0, 0, 1, 1], [], []>} : vector<32x32xf32>, vector<32x128xf32>, vector<32x128xf32> -> vector<32x128xf32>
    %28 = vector.broadcast %24 : vector<1x128xf32> to vector<32x128xf32>
    %29 = arith.addf %27, %28 : vector<32x128xf32>
    %cst_34 = arith.constant 0.000000e+00 : f32
    %30 = vector.broadcast %cst_34 : f32 to vector<32x128xf32>
    %31 = arith.maximumf %29, %30 : vector<32x128xf32>
    %c0_35 = arith.constant 0 : index
    %c0_36 = arith.constant 0 : index
    %32 = vector.load %arg13[%c0_35, %c0_36] : memref<32x128xf32, #tpu.memory_space<vmem>>, vector<32x128xf32>
    tpu.vector_store %arg13[%c0_35, %c0_36], %31 {strides = array<i32>} : memref<32x128xf32, #tpu.memory_space<vmem>>, vector<32x128xf32>,
    %c0_37 = arith.constant 0 : index
    %c0_38 = arith.constant 0 : index
    %33 = vector.load %arg5[%c0_37, %c0_38] : memref<128x128xf32, #tpu.memory_space<vmem>>, vector<128x128xf32>
    %c0_39 = arith.constant 0 : index
    %c0_40 = arith.constant 0 : index
    %34 = vector.load %arg10[%c0_39, %c0_40] : memref<1x128xf32, #tpu.memory_space<vmem>>, vector<1x128xf32>
    %c0_41 = arith.constant 0 : index
    %c0_42 = arith.constant 0 : index
    %35 = vector.load %arg13[%c0_41, %c0_42] : memref<32x128xf32, #tpu.memory_space<vmem>>, vector<32x128xf32>
    %cst_43 = arith.constant dense<0.000000e+00> : vector<32x128xf32>
    %36 = tpu.matmul %35, %33, %cst_43 {dimension_numbers = #tpu.dot_dimension_numbers<[1], [0], [0], [1], [0, 0, 1, 1], [], []>} : vector<32x128xf32>, vector<128x128xf32>, vector<32x128xf32> -> vector<32x128xf32>
    %cst_44 = arith.constant dense<0.000000e+00> : vector<32x128xf32>
    %37 = tpu.matmul %0, %36, %cst_44 {dimension_numbers = #tpu.dot_dimension_numbers<[1], [0], [0], [1], [0, 0, 1, 1], [], []>} : vector<32x32xf32>, vector<32x128xf32>, vector<32x128xf32> -> vector<32x128xf32>
    %38 = vector.broadcast %34 : vector<1x128xf32> to vector<32x128xf32>
    %39 = arith.addf %37, %38 : vector<32x128xf32>
    %cst_45 = arith.constant 0.000000e+00 : f32
    %40 = vector.broadcast %cst_45 : f32 to vector<32x128xf32>
    %41 = arith.maximumf %39, %40 : vector<32x128xf32>
    %c0_46 = arith.constant 0 : index
    %c0_47 = arith.constant 0 : index
    %42 = vector.load %arg13[%c0_46, %c0_47] : memref<32x128xf32, #tpu.memory_space<vmem>>, vector<32x128xf32>
    tpu.vector_store %arg13[%c0_46, %c0_47], %41 {strides = array<i32>} : memref<32x128xf32, #tpu.memory_space<vmem>>, vector<32x128xf32>,
    %c0_48 = arith.constant 0 : index
    %c0_49 = arith.constant 0 : index
    %43 = vector.load %arg6[%c0_48, %c0_49] : memref<128x128xf32, #tpu.memory_space<vmem>>, vector<128x128xf32>
    %c0_50 = arith.constant 0 : index
    %c0_51 = arith.constant 0 : index
    %44 = vector.load %arg11[%c0_50, %c0_51] : memref<1x128xf32, #tpu.memory_space<vmem>>, vector<1x128xf32>
    %c0_52 = arith.constant 0 : index
    %c0_53 = arith.constant 0 : index
    %45 = vector.load %arg13[%c0_52, %c0_53] : memref<32x128xf32, #tpu.memory_space<vmem>>, vector<32x128xf32>
    %cst_54 = arith.constant dense<0.000000e+00> : vector<32x128xf32>
    %46 = tpu.matmul %45, %43, %cst_54 {dimension_numbers = #tpu.dot_dimension_numbers<[1], [0], [0], [1], [0, 0, 1, 1], [], []>} : vector<32x128xf32>, vector<128x128xf32>, vector<32x128xf32> -> vector<32x128xf32>
    %cst_55 = arith.constant dense<0.000000e+00> : vector<32x128xf32>
    %47 = tpu.matmul %0, %46, %cst_55 {dimension_numbers = #tpu.dot_dimension_numbers<[1], [0], [0], [1], [0, 0, 1, 1], [], []>} : vector<32x32xf32>, vector<32x128xf32>, vector<32x128xf32> -> vector<32x128xf32>
    %48 = vector.broadcast %44 : vector<1x128xf32> to vector<32x128xf32>
    %49 = arith.addf %47, %48 : vector<32x128xf32>
    %c0_56 = arith.constant 0 : index
    %c0_57 = arith.constant 0 : index
    %50 = vector.load %arg12[%c0_56, %c0_57] : memref<32x128xf32, #tpu.memory_space<vmem>>, vector<32x128xf32>
    tpu.vector_store %arg12[%c0_56, %c0_57], %49 {strides = array<i32>} : memref<32x128xf32, #tpu.memory_space<vmem>>, vector<32x128xf32>,
    return
  }
}

</mosaic_0001>

<bundles_post_ra>
// kernel: tpu_custom_call.1
= control target key start
LH: loop header
LB: loop body
LE: loop exit
PB: predicated region body
PF: predicated region fallthrough
CT: control target
= control target key end

     0   :  { %17 = vsyncpa [#allocation4], 0  ;;  %s2303_s0 = inlined_call_operand.hbm [shape: f32[32,32], index: 0, kind: input, shape index: {}]   ;;  %s2304_s1 = inlined_call_operand.hbm [shape: f32[32,128], index: 1, kind: input, shape index: {}]   ;;  %s2305_s2 = inlined_call_operand.hbm [shape: f32[128,128], index: 2, kind: input, shape index: {}]   ;;  %s2306_s3 = inlined_call_operand.hbm [shape: f32[128,128], index: 3, kind: input, shape index: {}]   ;;  %s2307_s4 = inlined_call_operand.hbm [shape: f32[128,128], index: 4, kind: input, shape index: {}]   ;;  %s2308_s5 = inlined_call_operand.hbm [shape: f32[128,128], index: 5, kind: input, shape index: {}]   ;;  %s2309_s6 = inlined_call_operand.hbm [shape: f32[128,128], index: 6, kind: input, shape index: {}]   ;;  %s2310_s7 = inlined_call_operand.vmem [shape: f32[1,128], index: 7, kind: input, shape index: {}]   ;;  %s2311_s8 = inlined_call_operand.vmem [shape: f32[1,128], index: 8, kind: input, shape index: {}]   ;;  %s2312_s9 = inlined_call_operand.vmem [shape: f32[1,128], index: 9, kind: input, shape index: {}]   ;;  %s2313_s10 = inlined_call_operand.vmem [shape: f32[1,128], index: 10, kind: input, shape index: {}]   ;;  %s2314_s11 = inlined_call_operand.vmem [shape: f32[1,128], index: 11, kind: input, shape index: {}]   ;;  %s2315_s12 = inlined_call_operand.hbm [shape: f32[32,128], index: 12, kind: output, shape index: {}]  }
   0x1   :  { %18 = vsyncpa [#allocation7], 0 }
   0x2   :  { %19 = vsyncpa [#allocation10], 0 }
   0x3   :  { %20 = vsyncpa [#allocation13], 0 }
   0x4   :  { %21 = vsyncpa [#allocation5], 0  ;;  %s2024_s21 = smov [#allocation6]   ;;  %s2025_s23 = smov [#allocation9]  }
   0x5   :  { %s39_s22 = sshll.u32 %s2024_s21, 4  ;;  %s63_s24 = sshll.u32 %s2025_s23, 4  ;;  %s40_s22 = int_to_ptr.vmem [resolvable:$true] %s39_s22  ;;  %s2099_s24 = int_to_ptr.vmem [resolvable:$true] %s63_s24 }
   0x6   :  { %s1838_s27 = scalar_lea.hbm %s2304_s1, 512 }
   0x7   :  { %p1839_p0 = scmp.ne.s32.totalorder %s2304_s1, %s1838_s27  ;;  %p1842_p1 = scmp.lt.u32.totalorder %s1838_s27, %s2304_s1 }
   0x9   :  { %p1844_p2 = pnand %p1842_p1, %p1839_p0 }
   0xb   :  { %1847 = shalt.err (!%p1844_p2)
}
   0xc   :  { %s1848_s14 = scalar_lea.vmem %s40_s22, 512  ;;  %p1853_p4 = scmp.lt.s32.totalorder %s40_s22, %s40_s22 }
   0xd   :  { %p1849_p3 = scmp.ne.s32.totalorder %s40_s22, %s1848_s14  ;;  %p1854_p5 = scmp.lt.s32.totalorder %s1848_s14, %s1848_s14 }
   0xf   :  { %p1855_p6 = por %p1854_p5, %p1853_p4 }
  0x11   :  { %p1856_p7 = pnand %p1855_p6, %p1849_p3 }
  0x13   :  { %1859 = shalt.err (!%p1856_p7)
}
  0x14   :  { %s2026_s15 = smov 128   ;;  %s2027_s16 = smov 8  }
  0x15   :  { %45 = dma.hbm_to_vmem [thread:$0]  %s2304_s1, 512, %s40_s22, [#allocation7], %s2026_s15, %s2026_s15, %s2027_s16  }
  0x16   :  { %s1860_s21 = scalar_lea.hbm %s2306_s3, 2048 }
  0x17   :  { %p1861_p8 = scmp.ne.s32.totalorder %s2306_s3, %s1860_s21  ;;  %p1864_p9 = scmp.lt.u32.totalorder %s1860_s21, %s2306_s3 }
  0x19   :  { %p1866_p10 = pnand %p1864_p9, %p1861_p8 }
  0x1b   :  { %1869 = shalt.err (!%p1866_p10)
}
  0x1c   :  { %s1870_s28 = scalar_lea.vmem %s2099_s24, 2048  ;;  %p1875_p12 = scmp.lt.s32.totalorder %s2099_s24, %s2099_s24 }
  0x1d   :  { %p1871_p11 = scmp.ne.s32.totalorder %s2099_s24, %s1870_s28  ;;  %p1876_p13 = scmp.lt.s32.totalorder %s1870_s28, %s1870_s28 }
  0x1f   :  { %p1877_p0 = por %p1876_p13, %p1875_p12 }
  0x21   :  { %p1878_p1 = pnand %p1877_p0, %p1871_p11 }
  0x23   :  { %1881 = shalt.err (!%p1878_p1)
}
  0x24   :  { %69 = dma.hbm_to_vmem [thread:$0]  %s2306_s3, 2048, %s2099_s24, [#allocation10], %s2026_s15, %s2026_s15, %s2027_s16  }
  0x25   :  { %s2028_s29 = smov [#allocation12]   ;;  %s2029_s13 = smov [#allocation3]  }
  0x26   :  { %s87_s30 = sshll.u32 %s2028_s29, 4  ;;  %s27_s14 = sshll.u32 %s2029_s13, 4  ;;  %s88_s30 = int_to_ptr.vmem [resolvable:$true] %s87_s30  ;;  %s2136_s14 = int_to_ptr.vmem [resolvable:$true] %s27_s14 }
  0x27   :  { %s1882_s19 = scalar_lea.hbm %s2308_s5, 2048 }
  0x28   :  { %p1883_p2 = scmp.ne.s32.totalorder %s2308_s5, %s1882_s19  ;;  %p1886_p3 = scmp.lt.u32.totalorder %s1882_s19, %s2308_s5 }
  0x2a   :  { %p1888_p4 = pnand %p1886_p3, %p1883_p2 }
  0x2c   :  { %1891 = shalt.err (!%p1888_p4)
}
  0x2d   :  { %s1892_s3 = scalar_lea.vmem %s88_s30, 2048  ;;  %p1897_p6 = scmp.lt.s32.totalorder %s88_s30, %s88_s30 }
  0x2e   :  { %p1893_p5 = scmp.ne.s32.totalorder %s88_s30, %s1892_s3  ;;  %p1898_p7 = scmp.lt.s32.totalorder %s1892_s3, %s1892_s3 }
  0x30   :  { %p1899_p8 = por %p1898_p7, %p1897_p6 }
  0x32   :  { %p1900_p9 = pnand %p1899_p8, %p1893_p5 }
  0x34   :  { %1903 = shalt.err (!%p1900_p9)
}
  0x35   :  { %93 = dma.hbm_to_vmem [thread:$0]  %s2308_s5, 2048, %s88_s30, [#allocation13], %s2026_s15, %s2026_s15, %s2027_s16  }
  0x36   :  { %s1904_s1 = scalar_lea.hbm %s2303_s0, 512 }
  0x37   :  { %p1905_p10 = scmp.ne.s32.totalorder %s2303_s0, %s1904_s1  ;;  %p1908_p11 = scmp.lt.u32.totalorder %s1904_s1, %s2303_s0 }
  0x39   :  { %p1910_p12 = pnand %p1908_p11, %p1905_p10 }
  0x3b   :  { %1913 = shalt.err (!%p1910_p12)
}
  0x3c   :  { %s1914_s18 = scalar_lea.vmem %s2136_s14, 512  ;;  %p1919_p0 = scmp.lt.s32.totalorder %s2136_s14, %s2136_s14 }
  0x3d   :  { %p1915_p13 = scmp.ne.s32.totalorder %s2136_s14, %s1914_s18  ;;  %p1920_p1 = scmp.lt.s32.totalorder %s1914_s18, %s1914_s18 }
  0x3f   :  { %p1921_p2 = por %p1920_p1, %p1919_p0 }
  0x41   :  { %p1922_p3 = pnand %p1921_p2, %p1915_p13 }
  0x43   :  { %1925 = shalt.err (!%p1922_p3)
}
  0x44   :  { %33 = dma.hbm_to_vmem [thread:$0]  %s2303_s0, 512, %s2136_s14, [#allocation4], %s2026_s15, %s2026_s15, %s2027_s16  }
  0x45   :  { %s2030_s19 = smov [#allocation8]   ;;  %s2031_s21 = smov [#allocation11]  }
  0x46   :  { %s51_s20 = sshll.u32 %s2030_s19, 4  ;;  %s75_s23 = sshll.u32 %s2031_s21, 4  ;;  %s52_s20 = int_to_ptr.vmem [resolvable:$true] %s51_s20  ;;  %s2173_s23 = int_to_ptr.vmem [resolvable:$true] %s75_s23 }
  0x47   :  { %s1926_s24 = scalar_lea.hbm %s2305_s2, 2048 }
  0x48   :  { %p1927_p4 = scmp.ne.s32.totalorder %s2305_s2, %s1926_s24  ;;  %p1930_p5 = scmp.lt.u32.totalorder %s1926_s24, %s2305_s2 }
  0x4a   :  { %p1932_p6 = pnand %p1930_p5, %p1927_p4 }
  0x4c   :  { %1935 = shalt.err (!%p1932_p6)
}
  0x4d   :  { %s1936_s0 = scalar_lea.vmem %s52_s20, 2048  ;;  %p1941_p8 = scmp.lt.s32.totalorder %s52_s20, %s52_s20 }
  0x4e   :  { %p1937_p7 = scmp.ne.s32.totalorder %s52_s20, %s1936_s0  ;;  %p1942_p9 = scmp.lt.s32.totalorder %s1936_s0, %s1936_s0 }
  0x50   :  { %p1943_p10 = por %p1942_p9, %p1941_p8 }
  0x52   :  { %p1944_p11 = pnand %p1943_p10, %p1937_p7 }
  0x54   :  { %1947 = shalt.err (!%p1944_p11)
}
  0x55   :  { %57 = dma.hbm_to_vmem [thread:$0]  %s2305_s2, 2048, %s52_s20, [#allocation7], %s2026_s15, %s2026_s15, %s2027_s16  }
  0x56   :  { %s1948_s17 = scalar_lea.hbm %s2307_s4, 2048 }
  0x57   :  { %p1949_p12 = scmp.ne.s32.totalorder %s2307_s4, %s1948_s17  ;;  %p1952_p13 = scmp.lt.u32.totalorder %s1948_s17, %s2307_s4 }
  0x59   :  { %p1954_p0 = pnand %p1952_p13, %p1949_p12 }
  0x5b   :  { %1957 = shalt.err (!%p1954_p0)
}
  0x5c   :  { %s1958_s21 = scalar_lea.vmem %s2173_s23, 2048  ;;  %p1963_p2 = scmp.lt.s32.totalorder %s2173_s23, %s2173_s23 }
  0x5d   :  { %p1959_p1 = scmp.ne.s32.totalorder %s2173_s23, %s1958_s21  ;;  %p1964_p3 = scmp.lt.s32.totalorder %s1958_s21, %s1958_s21 }
  0x5f   :  { %p1965_p4 = por %p1964_p3, %p1963_p2 }
  0x61   :  { %p1966_p5 = pnand %p1965_p4, %p1959_p1 }
  0x63   :  { %1969 = shalt.err (!%p1966_p5)
}
  0x64   :  { %81 = dma.hbm_to_vmem [thread:$0]  %s2307_s4, 2048, %s2173_s23, [#allocation10], %s2026_s15, %s2026_s15, %s2027_s16  }
  0x65   :  { %s2032_s25 = smov [#allocation14]   ;;  %s1970_s27 = scalar_lea.hbm %s2309_s6, 2048 }
  0x66   :  { %s99_s3 = sshll.u32 %s2032_s25, 4  ;;  %p1971_p6 = scmp.ne.s32.totalorder %s2309_s6, %s1970_s27  ;;  %s100_s3 = int_to_ptr.vmem [resolvable:$true] %s99_s3 }
  0x67   :  { %p1974_p7 = scmp.lt.u32.totalorder %s1970_s27, %s2309_s6 }
  0x69   :  { %p1976_p8 = pnand %p1974_p7, %p1971_p6 }
  0x6b   :  { %1979 = shalt.err (!%p1976_p8)
}
  0x6c   :  { %s1980_s22 = scalar_lea.vmem %s100_s3, 2048  ;;  %p1985_p10 = scmp.lt.s32.totalorder %s100_s3, %s100_s3 }
  0x6d   :  { %p1981_p9 = scmp.ne.s32.totalorder %s100_s3, %s1980_s22  ;;  %p1986_p11 = scmp.lt.s32.totalorder %s1980_s22, %s1980_s22 }
  0x6f   :  { %p1987_p12 = por %p1986_p11, %p1985_p10 }
  0x71   :  { %p1988_p13 = pnand %p1987_p12, %p1981_p9 }
  0x73   :  { %1991 = shalt.err (!%p1988_p13)
}
  0x74   :  { %105 = dma.hbm_to_vmem [thread:$0]  %s2309_s6, 2048, %s100_s3, [#allocation13], %s2026_s15, %s2026_s15, %s2027_s16  }
  0x75   :  { %2014 = dma.done.wait [#allocation4], 512  }
  0x76   :  { %2015 = vsyncadd [#allocation4], 4294966784 }
  0x77   :  { %2016 = dma.done.wait [#allocation7], 2560  }
  0x78   :  { %2017 = vsyncadd [#allocation7], 4294964736 }
  0x79   :  { %2018 = dma.done.wait [#allocation10], 4096  }
  0x7a   :  { %2019 = vsyncadd [#allocation10], 4294963200 }
  0x7b   :  { %2020 = dma.done.wait [#allocation13], 4096  }
  0x7c   :  { %2021 = vsyncadd [#allocation13], 4294963200  ;;  %v149_v0 = vld [vmem:[#allocation8] sm:$0xff]  ;;  %v150_v1 = vld [vmem:[#allocation8 + $0x8] sm:$0xff]  ;;  %vm261_vm0 = vcmask 261120   ;;  %s2033_s30 = smov [#allocation15]  }
  0x7d   :  { %v151_v2 = vld [vmem:[#allocation8 + $0x10] sm:$0xff]  ;;  %v1628_v3 = vpack.c.bf16 %v150_v1, %v149_v0  ;;  %v152_v4 = vld [vmem:[#allocation8 + $0x18] sm:$0xff]  ;;  %v153_v6 = vld [vmem:[#allocation8 + $0x20] sm:$0xff]  ;;  %s1188_s19 = sshll.u32 %s2033_s30, 4  ;;  %s1189_s19 = int_to_ptr.vmem [resolvable:$true] %s1188_s19 }
  0x7e   :  { %v1632_v5 = vpack.c.bf16 %v152_v4, %v151_v2  ;;  %v154_v7 = vld [vmem:[#allocation8 + $0x28] sm:$0xff]  ;;  %v141_v9 = vld [vmem:[#allocation6] sm:$0xff]  ;;  %v155_v10 = vld [vmem:[#allocation8 + $0x30] sm:$0xff]  ;;  %s1992_s21 = scalar_lea.vmem %s1189_s19, 512  ;;  %p1997_p1 = scmp.lt.s32.totalorder %s1189_s19, %s1189_s19 }
  0x7f   :  { %1629 = vmatprep.subr.bf16.mxu0 %v1628_v3  ;;  %v1636_v8 = vpack.c.bf16 %v154_v7, %v153_v6  ;;  %v156_v11 = vld [vmem:[#allocation8 + $0x38] sm:$0xff]  ;;  %1400 = vmatprep.mubr.f32.mxu0 %v141_v9  ;;  %v157_v13 = vld [vmem:[#allocation8 + $0x40] sm:$0xff]  ;;  %v158_v14 = vld [vmem:[#allocation8 + $0x48] sm:$0xff]  ;;  %p1993_p0 = scmp.ne.s32.totalorder %s1189_s19, %s1992_s21  ;;  %p1998_p2 = scmp.lt.s32.totalorder %s1992_s21, %s1992_s21 }
  0x80   :  { %1631 = vmatpush3.bf16.msra.mxu0 %v1628_v3  ;;  %v1640_v12 = vpack.c.bf16 %v156_v11, %v155_v10  ;;  %v1644_v15 = vpack.c.bf16 %v158_v14, %v157_v13  ;;  %v159_v16 = vld [vmem:[#allocation8 + $0x50] sm:$0xff]  ;;  %v160_v17 = vld [vmem:[#allocation8 + $0x58] sm:$0xff]  ;;  %v161_v19 = vld [vmem:[#allocation8 + $0x60] sm:$0xff] }
  0x81   :  { %1633 = vmatprep.subr.bf16.mxu0 %v1632_v5  ;;  %v1648_v18 = vpack.c.bf16 %v160_v17, %v159_v16  ;;  %v162_v20 = vld [vmem:[#allocation8 + $0x68] sm:$0xff]  ;;  %v163_v22 = vld [vmem:[#allocation8 + $0x70] sm:$0xff]  ;;  %v164_v23 = vld [vmem:[#allocation8 + $0x78] sm:$0xff]  ;;  %p1999_p3 = por %p1998_p2, %p1997_p1 }
  0x82   :  { %v1652_v21 = vpack.c.bf16 %v162_v20, %v161_v19  ;;  %v1656_v24 = vpack.c.bf16 %v164_v23, %v163_v22  ;;  %v142_v25 = vld [vmem:[#allocation6 + $0x8] sm:$0xff]  ;;  %v143_v26 = vld [vmem:[#allocation6 + $0x10] sm:$0xff]  ;;  %v144_v27 = vld [vmem:[#allocation6 + $0x18] sm:$0xff] }
  0x83   :  { %v2225_v28 = vld [vmem:[#allocation3] sm:$0xff]  ;;  %v368_v33 = vld [vmem:[#allocation9 + $0x8] sm:$0xff]  ;;  %v369_v38 = vld [vmem:[#allocation9 + $0x10] sm:$0xff]  ;;  %p2000_p4 = pnand %p1999_p3, %p1993_p0 }
  0x84   :  { %1635 = vmatpush3.bf16.msra.mxu0 %v1632_v5  ;;  %1414 = vmatprep.mubr.msk.f32.mxu1 %vm261_vm0, %v2225_v28  ;;  %v367_v32 = vld [vmem:[#allocation9] sm:$0xff]  ;;  %v370_v39 = vld [vmem:[#allocation9 + $0x18] sm:$0xff]  ;;  %v2229_v40 = vld [vmem:[#allocation3 + $0x8] sm:$0xff] }
  0x85   :  { %1637 = vmatprep.subr.bf16.mxu0 %v1636_v8  ;;  %v1668_v37 = vpack.c.bf16 %v368_v33, %v367_v32  ;;  %v2231_v41 = vld [vmem:[#allocation3 + $0x10] sm:$0xff]  ;;  %v1672_v42 = vpack.c.bf16 %v370_v39, %v369_v38  ;;  %v371_v43 = vld [vmem:[#allocation9 + $0x20] sm:$0xff]  ;;  %v372_v44 = vld [vmem:[#allocation9 + $0x28] sm:$0xff] }
  0x86   :  { %v2237_v45 = vld [vmem:[#allocation3 + $0x18] sm:$0xff]  ;;  %v1676_v46 = vpack.c.bf16 %v372_v44, %v371_v43  ;;  %v373_v47 = vld [vmem:[#allocation9 + $0x30] sm:$0xff]  ;;  %v375_v50 = vld [vmem:[#allocation9 + $0x40] sm:$0xff] }
  0x87   :  { %v374_v48 = vld [vmem:[#allocation9 + $0x38] sm:$0xff]  ;;  %v376_v51 = vld [vmem:[#allocation9 + $0x48] sm:$0xff]  ;;  %v377_v53 = vld [vmem:[#allocation9 + $0x50] sm:$0xff] }
  0x88   :  { %1639 = vmatpush3.bf16.msra.mxu0 %v1636_v8  ;;  %v1680_v49 = vpack.c.bf16 %v374_v48, %v373_v47  ;;  %v1684_v52 = vpack.c.bf16 %v376_v51, %v375_v50  ;;  %v378_v54 = vld [vmem:[#allocation9 + $0x58] sm:$0xff]  ;;  %v379_v56 = vld [vmem:[#allocation9 + $0x60] sm:$0xff]  ;;  %v380_v57 = vld [vmem:[#allocation9 + $0x68] sm:$0xff] }
  0x89   :  { %1641 = vmatprep.subr.bf16.mxu0 %v1640_v12  ;;  %v1688_v55 = vpack.c.bf16 %v378_v54, %v377_v53  ;;  %v1692_v58 = vpack.c.bf16 %v380_v57, %v379_v56  ;;  %v381_v59 = vld [vmem:[#allocation9 + $0x70] sm:$0xff]  ;;  %v382_v60 = vld [vmem:[#allocation9 + $0x78] sm:$0xff]  ;;  %v1203_v62 = vld [vmem:[%s2310_s7] ss:$0 sm:$0xff] }
  0x8a   :  { %v1696_v61 = vpack.c.bf16 %v382_v60, %v381_v59  ;;  %v572_v11 = vld [vmem:[#allocation11] sm:$0xff]  ;;  %v574_v13 = vld [vmem:[#allocation11 + $0x10] sm:$0xff] }
  0x8b   :  { %v576_v17 = vld [vmem:[#allocation11 + $0x20] sm:$0xff]  ;;  %v578_v20 = vld [vmem:[#allocation11 + $0x30] sm:$0xff] }
  0x8c   :  { %1643 = vmatpush3.bf16.msra.mxu0 %v1640_v12  ;;  %v573_v12 = vld [vmem:[#allocation11 + $0x8] sm:$0xff]  ;;  %v580_v23 = vld [vmem:[#allocation11 + $0x40] sm:$0xff]  ;;  %v586_v39 = vld [vmem:[#allocation11 + $0x70] sm:$0xff] }
  0x8d   :  { %1645 = vmatprep.subr.bf16.mxu0 %v1644_v15  ;;  %v1708_v14 = vpack.c.bf16 %v573_v12, %v572_v11  ;;  %v1208_v44 = vld [vmem:[%s2311_s8] ss:$0 sm:$0xff] }
  0x8e   :  { %v785_v12 = vld [vmem:[#allocation12 + $0x40] sm:$0xff] }
  0x90   :  { %1647 = vmatpush3.bf16.msra.mxu0 %v1644_v15  ;;  %v575_v15 = vld [vmem:[#allocation11 + $0x18] sm:$0xff] }
  0x91   :  { %1649 = vmatprep.subr.bf16.mxu0 %v1648_v18  ;;  %v1712_v16 = vpack.c.bf16 %v575_v15, %v574_v13  ;;  %v786_v13 = vld [vmem:[#allocation12 + $0x48] sm:$0xff]  ;;  %v787_v15 = vld [vmem:[#allocation12 + $0x50] sm:$0xff] }
  0x94   :  { %1651 = vmatpush3.bf16.msra.mxu0 %v1648_v18  ;;  %v577_v18 = vld [vmem:[#allocation11 + $0x28] sm:$0xff] }
  0x95   :  { %1653 = vmatprep.subr.bf16.mxu0 %v1652_v21  ;;  %v1716_v19 = vpack.c.bf16 %v577_v18, %v576_v17  ;;  %v789_v18 = vld [vmem:[#allocation12 + $0x60] sm:$0xff] }
  0x98   :  { %1655 = vmatpush3.bf16.msra.mxu0 %v1652_v21  ;;  %v579_v21 = vld [vmem:[#allocation11 + $0x38] sm:$0xff] }
  0x99   :  { %1657 = vmatprep.subr.bf16.mxu0 %v1656_v24  ;;  %v1720_v22 = vpack.c.bf16 %v579_v21, %v578_v20  ;;  %v791_v21 = vld [vmem:[#allocation12 + $0x70] sm:$0xff] }
  0x9c   :  { %1659 = vmatpush3.bf16.msra.mxu0 %v1656_v24  ;;  %v581_v24 = vld [vmem:[#allocation11 + $0x48] sm:$0xff] }
  0x9d   :  { %1709 = vmatprep.subr.bf16.mxu0 %v1708_v14 }
  0x9f   :  { %1401 = vmatmul.mubr.f32.vlgmr.msra.gmra.mrb[0].mxu0 %v142_v25  ;;  %v1724_v25 = vpack.c.bf16 %v581_v24, %v580_v23  ;;  %v1213_v24 = vld [vmem:[%s2312_s9] ss:$0 sm:$0xff] }
  0xa0   :  { %1403 = vmatprep.mubr.f32.mxu0 %v143_v26  ;;  %1711 = vmatpush3.bf16.msra.mxu0 %v1708_v14  ;;  %v582_v26 = vld [vmem:[#allocation11 + $0x50] sm:$0xff]  ;;  %v1764_v14 = vpack.c.bf16 %v786_v13, %v785_v12 }
  0xa1   :  { %1713 = vmatprep.subr.bf16.mxu0 %v1712_v16 }
  0xa3   :  { %1404 = vmatmul.mubr.f32.gmra.mrb[2].mxu0 %v144_v27  ;;  %v583_v27 = vld [vmem:[#allocation11 + $0x58] sm:$0xff] }
  0xa4   :  { %1715 = vmatpush3.bf16.msra.mxu0 %v1712_v16  ;;  %v788_v16 = vld [vmem:[#allocation12 + $0x58] sm:$0xff] }
  0xa5   :  { %1717 = vmatprep.subr.bf16.mxu0 %v1716_v19  ;;  %v1768_v17 = vpack.c.bf16 %v788_v16, %v787_v15 }
  0xa8   :  { %1719 = vmatpush3.bf16.msra.mxu0 %v1716_v19  ;;  %v790_v19 = vld [vmem:[#allocation12 + $0x68] sm:$0xff] }
  0xa9   :  { %1721 = vmatprep.subr.bf16.mxu0 %v1720_v22  ;;  %v1772_v20 = vpack.c.bf16 %v790_v19, %v789_v18 }
  0xac   :  { %1723 = vmatpush3.bf16.msra.mxu0 %v1720_v22  ;;  %v792_v22 = vld [vmem:[#allocation12 + $0x78] sm:$0xff] }
  0xad   :  { %1725 = vmatprep.subr.bf16.mxu0 %v1724_v25  ;;  %v1776_v23 = vpack.c.bf16 %v792_v22, %v791_v21 }
  0xb0   :  { %1727 = vmatpush3.bf16.msra.mxu0 %v1724_v25 }
 0x172   :  { %v1402_v29 = vpop.f32.mrb[0].mxu0 }
 0x173   :  { %v236_v30 = vpop.f32.mrb[1].mxu0 }
 0x174   :  { %v1660_v31 = vpack.c.bf16 %v1402_v29, %v236_v30  ;;  %v1728_v29 = vpack.c.bf16 %v583_v27, %v582_v26  ;;  %v584_v30 = vld [vmem:[#allocation11 + $0x60] sm:$0xff] }
 0x176   :  { %v1405_v34 = vpop.f32.mrb[2].mxu0  ;;  %1661 = vmatprep.subr.bf16.mxu1 %v1660_v31  ;;  %1729 = vmatprep.subr.bf16.mxu0 %v1728_v29 }
 0x177   :  { %v246_v35 = vpop.f32.mrb[3].mxu0  ;;  %1663 = vmatpush3.bf16.msra.mxu1 %v1660_v31  ;;  %v585_v31 = vld [vmem:[#allocation11 + $0x68] sm:$0xff]  ;;  %1731 = vmatpush3.bf16.msra.mxu0 %v1728_v29 }
 0x178   :  { %v1664_v36 = vpack.c.bf16 %v1405_v34, %v246_v35  ;;  %v1732_v32 = vpack.c.bf16 %v585_v31, %v584_v30 }
 0x17a   :  { %1665 = vmatprep.subr.bf16.mxu1 %v1664_v36  ;;  %1733 = vmatprep.subr.bf16.mxu0 %v1732_v32 }
 0x17b   :  { %1667 = vmatpush3.bf16.msra.mxu1 %v1664_v36  ;;  %1735 = vmatpush3.bf16.msra.mxu0 %v1732_v32 }
 0x17c   :  { %1669 = vmatprep.subr.bf16.mxu1 %v1668_v37 }
 0x17e   :  { %1415 = vmatmul.mubr.msk.f32.vlgmr.msra.gmra.mrb[0].mxu1 %vm261_vm0, %v2229_v40 }
 0x17f   :  { %1417 = vmatprep.mubr.msk.f32.mxu1 %vm261_vm0, %v2231_v41  ;;  %1671 = vmatpush3.bf16.msra.mxu1 %v1668_v37 }
 0x180   :  { %1673 = vmatprep.subr.bf16.mxu1 %v1672_v42 }
 0x182   :  { %1418 = vmatmul.mubr.msk.f32.gmra.mrb[2].mxu1 %vm261_vm0, %v2237_v45 }
 0x183   :  { %1675 = vmatpush3.bf16.msra.mxu1 %v1672_v42  ;;  %v587_v42 = vld [vmem:[#allocation11 + $0x78] sm:$0xff] }
 0x184   :  { %1677 = vmatprep.subr.bf16.mxu1 %v1676_v46  ;;  %v1736_v43 = vpack.c.bf16 %v587_v42, %v586_v39 }
 0x186   :  { %1737 = vmatprep.subr.bf16.mxu0 %v1736_v43 }
 0x187   :  { %1679 = vmatpush3.bf16.msra.mxu1 %v1676_v46  ;;  %1739 = vmatpush3.bf16.msra.mxu0 %v1736_v43  ;;  %v982_v43 = vld [vmem:[#allocation14] sm:$0xff] }
 0x188   :  { %1681 = vmatprep.subr.bf16.mxu1 %v1680_v49 }
 0x18b   :  { %1683 = vmatpush3.bf16.msra.mxu1 %v1680_v49 }
 0x18c   :  { %1685 = vmatprep.subr.bf16.mxu1 %v1684_v52 }
 0x18f   :  { %1687 = vmatpush3.bf16.msra.mxu1 %v1684_v52 }
 0x190   :  { %1689 = vmatprep.subr.bf16.mxu1 %v1688_v55 }
 0x193   :  { %1691 = vmatpush3.bf16.msra.mxu1 %v1688_v55 }
 0x194   :  { %1693 = vmatprep.subr.bf16.mxu1 %v1692_v58 }
 0x197   :  { %1695 = vmatpush3.bf16.msra.mxu1 %v1692_v58 }
 0x198   :  { %1697 = vmatprep.subr.bf16.mxu1 %v1696_v61 }
 0x19b   :  { %1699 = vmatpush3.bf16.msra.mxu1 %v1696_v61  ;;  %v777_v61 = vld [vmem:[#allocation12] sm:$0xff] }
 0x251   :  { %v1416_v63 = vpop.f32.mrb[0].mxu1 }
 0x252   :  { %v346_v0 = vadd.f32 %v1416_v63, %v1203_v62  ;;  %v340_v1 = vpop.f32.mrb[1].mxu1 }
 0x253   :  { %v341_v2 = vadd.f32 %v1203_v62, %v340_v1 }
 0x254   :  { %v360_v5 = vmax.f32 %v346_v0, 0.0 }
 0x255   :  { %v359_v3 = vmax.f32 %v341_v2, 0.0  ;;  %v1419_v4 = vpop.f32.mrb[2].mxu1 }
 0x256   :  { %v356_v6 = vadd.f32 %v1419_v4, %v1203_v62  ;;  %v350_v7 = vpop.f32.mrb[3].mxu1  ;;  %v780_v4 = vld [vmem:[#allocation12 + $0x18] sm:$0xff] }
 0x257   :  { %v351_v8 = vadd.f32 %v1203_v62, %v350_v7  ;;  %1452 = vmatprep.mubr.f32.mxu1 %v359_v3  ;;  %v778_v62 = vld [vmem:[#allocation12 + $0x8] sm:$0xff]  ;;  %v779_v3 = vld [vmem:[#allocation12 + $0x10] sm:$0xff] }
 0x258   :  { %1453 = vmatmul.mubr.f32.vlgmr.msra.gmra.mrb[4].mxu1 %v360_v5  ;;  %v362_v10 = vmax.f32 %v356_v6, 0.0  ;;  %v1748_v2 = vpack.c.bf16 %v778_v62, %v777_v61  ;;  %v1752_v5 = vpack.c.bf16 %v780_v4, %v779_v3  ;;  %v781_v6 = vld [vmem:[#allocation12 + $0x20] sm:$0xff]  ;;  %v782_v7 = vld [vmem:[#allocation12 + $0x28] sm:$0xff]  ;;  %v992_v61 = vld [vmem:[#allocation14 + $0x50] sm:$0xff] }
 0x259   :  { %v361_v9 = vmax.f32 %v351_v8, 0.0  ;;  %v1756_v8 = vpack.c.bf16 %v782_v7, %v781_v6  ;;  %v993_v62 = vld [vmem:[#allocation14 + $0x58] sm:$0xff]  ;;  %v996_v3 = vld [vmem:[#allocation14 + $0x70] sm:$0xff]  ;;  %v1218_v6 = vld [vmem:[%s2313_s10] ss:$0 sm:$0xff] }
 0x25a   :  { %v997_v4 = vld [vmem:[#allocation14 + $0x78] sm:$0xff] }
 0x25b   :  { %1455 = vmatprep.mubr.f32.mxu1 %v361_v9  ;;  %v783_v9 = vld [vmem:[#allocation12 + $0x30] sm:$0xff] }
 0x25c   :  { %1456 = vmatmul.mubr.f32.gmra.mrb[6].mxu1 %v362_v10  ;;  %v784_v10 = vld [vmem:[#allocation12 + $0x38] sm:$0xff] }
 0x25d   :  { %1466 = vmatprep.mubr.msk.f32.mxu1 %vm261_vm0, %v2225_v28  ;;  %v1760_v11 = vpack.c.bf16 %v784_v10, %v783_v9 }
 0x32b   :  { %v1454_v33 = vpop.f32.mrb[4].mxu1 }
 0x32c   :  { %v454_v34 = vpop.f32.mrb[5].mxu1 }
 0x32d   :  { %v1700_v35 = vpack.c.bf16 %v1454_v33, %v454_v34 }
 0x32f   :  { %v1457_v36 = vpop.f32.mrb[6].mxu1  ;;  %1701 = vmatprep.subr.bf16.mxu1 %v1700_v35 }
 0x330   :  { %v464_v37 = vpop.f32.mrb[7].mxu1  ;;  %1703 = vmatpush3.bf16.msra.mxu1 %v1700_v35 }
 0x331   :  { %v1704_v38 = vpack.c.bf16 %v1457_v36, %v464_v37 }
 0x333   :  { %1705 = vmatprep.subr.bf16.mxu1 %v1704_v38 }
 0x334   :  { %1707 = vmatpush3.bf16.msra.mxu1 %v1704_v38 }
 0x337   :  { %1467 = vmatmul.mubr.msk.f32.vlgmr.msra.gmra.mrb[8].mxu1 %vm261_vm0, %v2229_v40 }
 0x338   :  { %1469 = vmatprep.mubr.msk.f32.mxu1 %vm261_vm0, %v2231_v41 }
 0x33b   :  { %1470 = vmatmul.mubr.msk.f32.gmra.mrb[10].mxu1 %vm261_vm0, %v2237_v45 }
 0x33c   :  { %1518 = vmatprep.mubr.msk.f32.mxu1 %vm261_vm0, %v2225_v28 }
 0x40a   :  { %v1468_v46 = vpop.f32.mrb[8].mxu1 }
 0x40b   :  { %v551_v47 = vadd.f32 %v1468_v46, %v1208_v44  ;;  %v545_v48 = vpop.f32.mrb[9].mxu1 }
 0x40c   :  { %v546_v49 = vadd.f32 %v1208_v44, %v545_v48 }
 0x40d   :  { %v565_v52 = vmax.f32 %v551_v47, 0.0 }
 0x40e   :  { %v564_v50 = vmax.f32 %v546_v49, 0.0  ;;  %v1471_v51 = vpop.f32.mrb[10].mxu1 }
 0x40f   :  { %v561_v53 = vadd.f32 %v1471_v51, %v1208_v44  ;;  %v555_v54 = vpop.f32.mrb[11].mxu1  ;;  %v985_v51 = vld [vmem:[#allocation14 + $0x18] sm:$0xff] }
 0x410   :  { %v556_v55 = vadd.f32 %v1208_v44, %v555_v54  ;;  %1504 = vmatprep.mubr.f32.mxu0 %v564_v50  ;;  %v983_v44 = vld [vmem:[#allocation14 + $0x8] sm:$0xff]  ;;  %v984_v50 = vld [vmem:[#allocation14 + $0x10] sm:$0xff] }
 0x411   :  { %1505 = vmatmul.mubr.f32.vlgmr.msra.gmra.mrb[4].mxu0 %v565_v52  ;;  %v567_v57 = vmax.f32 %v561_v53, 0.0  ;;  %v1788_v49 = vpack.c.bf16 %v983_v44, %v982_v43  ;;  %v1792_v52 = vpack.c.bf16 %v985_v51, %v984_v50  ;;  %v986_v53 = vld [vmem:[#allocation14 + $0x20] sm:$0xff]  ;;  %v987_v54 = vld [vmem:[#allocation14 + $0x28] sm:$0xff] }
 0x412   :  { %v566_v56 = vmax.f32 %v556_v55, 0.0  ;;  %v988_v55 = vld [vmem:[#allocation14 + $0x30] sm:$0xff] }
 0x414   :  { %1507 = vmatprep.mubr.f32.mxu0 %v566_v56  ;;  %v989_v56 = vld [vmem:[#allocation14 + $0x38] sm:$0xff] }
 0x415   :  { %1508 = vmatmul.mubr.f32.gmra.mrb[6].mxu0 %v567_v57  ;;  %v1800_v57 = vpack.c.bf16 %v989_v56, %v988_v55 }
 0x416   :  { %1570 = vmatprep.mubr.msk.f32.mxu0 %vm261_vm0, %v2225_v28 }
 0x4e4   :  { %v1506_v58 = vpop.f32.mrb[4].mxu0 }
 0x4e5   :  { %v659_v59 = vpop.f32.mrb[5].mxu0 }
 0x4e6   :  { %v1740_v60 = vpack.c.bf16 %v1506_v58, %v659_v59  ;;  %v990_v58 = vld [vmem:[#allocation14 + $0x40] sm:$0xff]  ;;  %v991_v59 = vld [vmem:[#allocation14 + $0x48] sm:$0xff] }
 0x4e8   :  { %v1509_v63 = vpop.f32.mrb[6].mxu0  ;;  %1741 = vmatprep.subr.bf16.mxu1 %v1740_v60 }
 0x4e9   :  { %v669_v0 = vpop.f32.mrb[7].mxu0  ;;  %1743 = vmatpush3.bf16.msra.mxu1 %v1740_v60  ;;  %v1804_v60 = vpack.c.bf16 %v991_v59, %v990_v58 }
 0x4ea   :  { %v1744_v1 = vpack.c.bf16 %v1509_v63, %v669_v0  ;;  %v1808_v63 = vpack.c.bf16 %v993_v62, %v992_v61  ;;  %v994_v0 = vld [vmem:[#allocation14 + $0x60] sm:$0xff] }
 0x4ec   :  { %1745 = vmatprep.subr.bf16.mxu1 %v1744_v1 }
 0x4ed   :  { %1747 = vmatpush3.bf16.msra.mxu1 %v1744_v1  ;;  %v995_v1 = vld [vmem:[#allocation14 + $0x68] sm:$0xff] }
 0x4ee   :  { %1749 = vmatprep.subr.bf16.mxu1 %v1748_v2 }
 0x4f0   :  { %1519 = vmatmul.mubr.msk.f32.vlgmr.msra.gmra.mrb[12].mxu1 %vm261_vm0, %v2229_v40 }
 0x4f1   :  { %1521 = vmatprep.mubr.msk.f32.mxu1 %vm261_vm0, %v2231_v41  ;;  %1751 = vmatpush3.bf16.msra.mxu1 %v1748_v2  ;;  %v1812_v2 = vpack.c.bf16 %v995_v1, %v994_v0 }
 0x4f2   :  { %1753 = vmatprep.subr.bf16.mxu1 %v1752_v5 }
 0x4f4   :  { %1522 = vmatmul.mubr.msk.f32.gmra.mrb[14].mxu1 %vm261_vm0, %v2237_v45 }
 0x4f5   :  { %1755 = vmatpush3.bf16.msra.mxu1 %v1752_v5  ;;  %v1816_v5 = vpack.c.bf16 %v997_v4, %v996_v3 }
 0x4f6   :  { %1757 = vmatprep.subr.bf16.mxu1 %v1756_v8 }
 0x4f9   :  { %1759 = vmatpush3.bf16.msra.mxu1 %v1756_v8 }
 0x4fa   :  { %1761 = vmatprep.subr.bf16.mxu1 %v1760_v11 }
 0x4fd   :  { %1763 = vmatpush3.bf16.msra.mxu1 %v1760_v11 }
 0x4fe   :  { %1765 = vmatprep.subr.bf16.mxu1 %v1764_v14 }
 0x501   :  { %1767 = vmatpush3.bf16.msra.mxu1 %v1764_v14 }
 0x502   :  { %1769 = vmatprep.subr.bf16.mxu1 %v1768_v17 }
 0x505   :  { %1771 = vmatpush3.bf16.msra.mxu1 %v1768_v17 }
 0x506   :  { %1773 = vmatprep.subr.bf16.mxu1 %v1772_v20 }
 0x509   :  { %1775 = vmatpush3.bf16.msra.mxu1 %v1772_v20 }
 0x50a   :  { %1777 = vmatprep.subr.bf16.mxu1 %v1776_v23 }
 0x50d   :  { %1779 = vmatpush3.bf16.msra.mxu1 %v1776_v23 }
 0x5c3   :  { %v1520_v25 = vpop.f32.mrb[12].mxu1 }
 0x5c4   :  { %v756_v26 = vadd.f32 %v1520_v25, %v1213_v24  ;;  %v750_v27 = vpop.f32.mrb[13].mxu1  ;;  %v1223_v25 = vld [vmem:[%s2314_s11] ss:$0 sm:$0xff] }
 0x5c5   :  { %v751_v29 = vadd.f32 %v1213_v24, %v750_v27 }
 0x5c6   :  { %v770_v32 = vmax.f32 %v756_v26, 0.0 }
 0x5c7   :  { %v769_v30 = vmax.f32 %v751_v29, 0.0  ;;  %v1523_v31 = vpop.f32.mrb[14].mxu1 }
 0x5c8   :  { %v766_v33 = vadd.f32 %v1523_v31, %v1213_v24  ;;  %v760_v34 = vpop.f32.mrb[15].mxu1 }
 0x5c9   :  { %v761_v35 = vadd.f32 %v1213_v24, %v760_v34  ;;  %1556 = vmatprep.mubr.f32.mxu1 %v769_v30 }
 0x5ca   :  { %1557 = vmatmul.mubr.f32.vlgmr.msra.gmra.mrb[16].mxu1 %v770_v32  ;;  %v772_v37 = vmax.f32 %v766_v33, 0.0 }
 0x5cb   :  { %v771_v36 = vmax.f32 %v761_v35, 0.0 }
 0x5cd   :  { %1559 = vmatprep.mubr.f32.mxu1 %v771_v36 }
 0x5ce   :  { %1560 = vmatmul.mubr.f32.gmra.mrb[18].mxu1 %v772_v37 }
 0x5cf   :  { %1622 = vmatprep.mubr.msk.f32.mxu1 %vm261_vm0, %v2225_v28  ;;  %v1796_v28 = vpack.c.bf16 %v987_v54, %v986_v53 }
 0x69d   :  { %v1558_v38 = vpop.f32.mrb[16].mxu1 }
 0x69e   :  { %v864_v39 = vpop.f32.mrb[17].mxu1 }
 0x69f   :  { %v1780_v42 = vpack.c.bf16 %v1558_v38, %v864_v39 }
 0x6a1   :  { %v1561_v46 = vpop.f32.mrb[18].mxu1  ;;  %1781 = vmatprep.subr.bf16.mxu0 %v1780_v42 }
 0x6a2   :  { %v874_v47 = vpop.f32.mrb[19].mxu1  ;;  %1783 = vmatpush3.bf16.msra.mxu0 %v1780_v42 }
 0x6a3   :  { %v1784_v48 = vpack.c.bf16 %v1561_v46, %v874_v47 }
 0x6a5   :  { %1785 = vmatprep.subr.bf16.mxu0 %v1784_v48 }
 0x6a6   :  { %1787 = vmatpush3.bf16.msra.mxu0 %v1784_v48 }
 0x6a7   :  { %1789 = vmatprep.subr.bf16.mxu0 %v1788_v49 }
 0x6a9   :  { %1571 = vmatmul.mubr.msk.f32.vlgmr.msra.gmra.mrb[8].mxu0 %vm261_vm0, %v2229_v40 }
 0x6aa   :  { %1573 = vmatprep.mubr.msk.f32.mxu0 %vm261_vm0, %v2231_v41  ;;  %1791 = vmatpush3.bf16.msra.mxu0 %v1788_v49 }
 0x6ab   :  { %1793 = vmatprep.subr.bf16.mxu0 %v1792_v52 }
 0x6ad   :  { %1574 = vmatmul.mubr.msk.f32.gmra.mrb[10].mxu0 %vm261_vm0, %v2237_v45 }
 0x6ae   :  { %1795 = vmatpush3.bf16.msra.mxu0 %v1792_v52 }
 0x6af   :  { %1797 = vmatprep.subr.bf16.mxu0 %v1796_v28 }
 0x6b2   :  { %1799 = vmatpush3.bf16.msra.mxu0 %v1796_v28 }
 0x6b3   :  { %1801 = vmatprep.subr.bf16.mxu0 %v1800_v57 }
 0x6b6   :  { %1803 = vmatpush3.bf16.msra.mxu0 %v1800_v57 }
 0x6b7   :  { %1805 = vmatprep.subr.bf16.mxu0 %v1804_v60 }
 0x6ba   :  { %1807 = vmatpush3.bf16.msra.mxu0 %v1804_v60 }
 0x6bb   :  { %1809 = vmatprep.subr.bf16.mxu0 %v1808_v63 }
 0x6be   :  { %1811 = vmatpush3.bf16.msra.mxu0 %v1808_v63 }
 0x6bf   :  { %1813 = vmatprep.subr.bf16.mxu0 %v1812_v2 }
 0x6c2   :  { %1815 = vmatpush3.bf16.msra.mxu0 %v1812_v2 }
 0x6c3   :  { %1817 = vmatprep.subr.bf16.mxu0 %v1816_v5 }
 0x6c6   :  { %1819 = vmatpush3.bf16.msra.mxu0 %v1816_v5 }
 0x77c   :  { %v1572_v7 = vpop.f32.mrb[8].mxu0 }
 0x77d   :  { %v961_v8 = vadd.f32 %v1572_v7, %v1218_v6  ;;  %v955_v9 = vpop.f32.mrb[9].mxu0 }
 0x77e   :  { %v956_v10 = vadd.f32 %v1218_v6, %v955_v9 }
 0x77f   :  { %v975_v13 = vmax.f32 %v961_v8, 0.0 }
 0x780   :  { %v974_v11 = vmax.f32 %v956_v10, 0.0  ;;  %v1575_v12 = vpop.f32.mrb[10].mxu0 }
 0x781   :  { %v971_v14 = vadd.f32 %v1575_v12, %v1218_v6  ;;  %v965_v15 = vpop.f32.mrb[11].mxu0 }
 0x782   :  { %v966_v16 = vadd.f32 %v1218_v6, %v965_v15  ;;  %1608 = vmatprep.mubr.f32.mxu0 %v974_v11 }
 0x783   :  { %1609 = vmatmul.mubr.f32.vlgmr.msra.gmra.mrb[12].mxu0 %v975_v13  ;;  %v977_v18 = vmax.f32 %v971_v14, 0.0 }
 0x784   :  { %v976_v17 = vmax.f32 %v966_v16, 0.0 }
 0x786   :  { %1611 = vmatprep.mubr.f32.mxu0 %v976_v17 }
 0x787   :  { %1612 = vmatmul.mubr.f32.gmra.mrb[14].mxu0 %v977_v18 }
 0x856   :  { %v1610_v19 = vpop.f32.mrb[12].mxu0 }
 0x857   :  { %v1069_v20 = vpop.f32.mrb[13].mxu0 }
 0x858   :  { %v1820_v21 = vpack.c.bf16 %v1610_v19, %v1069_v20 }
 0x85a   :  { %v1613_v22 = vpop.f32.mrb[14].mxu0  ;;  %1821 = vmatprep.subr.bf16.mxu1 %v1820_v21 }
 0x85b   :  { %v1079_v23 = vpop.f32.mrb[15].mxu0  ;;  %1823 = vmatpush3.bf16.msra.mxu1 %v1820_v21 }
 0x85c   :  { %v1824_v24 = vpack.c.bf16 %v1613_v22, %v1079_v23 }
 0x85e   :  { %1825 = vmatprep.subr.bf16.mxu1 %v1824_v24 }
 0x85f   :  { %1827 = vmatpush3.bf16.msra.mxu1 %v1824_v24 }
 0x862   :  { %1623 = vmatmul.mubr.msk.f32.vlgmr.msra.gmra.mrb[20].mxu1 %vm261_vm0, %v2229_v40 }
 0x863   :  { %1625 = vmatprep.mubr.msk.f32.mxu1 %vm261_vm0, %v2231_v41 }
 0x866   :  { %1626 = vmatmul.mubr.msk.f32.gmra.mrb[22].mxu1 %vm261_vm0, %v2237_v45 }
 0x935   :  { %v1624_v26 = vpop.f32.mrb[20].mxu1 }
 0x936   :  { %v1166_v27 = vadd.f32 %v1624_v26, %v1223_v25  ;;  %v1160_v29 = vpop.f32.mrb[21].mxu1 }
 0x937   :  { %v1161_v30 = vadd.f32 %v1223_v25, %v1160_v29 }
 0x938   :  { %1180 = vst [vmem:[#allocation15 + $0x8] sm:$0xff] %v1166_v27 }
 0x939   :  { %1179 = vst [vmem:[#allocation15] sm:$0xff] %v1161_v30  ;;  %v1627_v31 = vpop.f32.mrb[22].mxu1 }
 0x93a   :  { %v1176_v40 = vadd.f32 %v1627_v31, %v1223_v25  ;;  %v1170_v32 = vpop.f32.mrb[23].mxu1 }
 0x93b   :  { %v1171_v33 = vadd.f32 %v1223_v25, %v1170_v32 }
 0x93c   :  { %1182 = vst [vmem:[#allocation15 + $0x18] sm:$0xff] %v1176_v40 }
 0x93d   :  { %1181 = vst [vmem:[#allocation15 + $0x10] sm:$0xff] %v1171_v33 }
 0x93e   :  { %2003 = shalt.err (!%p2000_p4)
}
 0x93f   :  { %s2004_s20 = scalar_lea.hbm %s2315_s12, 512 }
 0x940   :  { %p2005_p5 = scmp.ne.s32.totalorder %s2315_s12, %s2004_s20  ;;  %p2008_p6 = scmp.lt.u32.totalorder %s2004_s20, %s2315_s12 }
 0x942   :  { %p2010_p7 = pnand %p2008_p6, %p2005_p5 }
 0x944   :  { %2013 = shalt.err (!%p2010_p7)
}
 0x945   :  { %1194 = dma.vmem_to_hbm [thread:$0]  %s1189_s19, 512, %s2315_s12, [#allocation5], %s2026_s15, %s2026_s15, %s2027_s16  }
 0x946   :  { %2022 = dma.done.wait [#allocation5], 512  }
 0x947   :  { %2023 = vsyncadd [#allocation5], 4294966784 }
 0x948   :  { %1198 = vsyncpa [#allocation4], 1 }
 0x949   :  { %1199 = vsyncpa [#allocation7], 1 }
 0x94a   :  { %1200 = vsyncpa [#allocation10], 1 }
 0x94b   :  { %1201 = vsyncpa [#allocation13], 1 }
 0x94c   :  { %1202 = vsyncpa [#allocation5], 1 }

</bundles_post_ra>
